<compile_context>
chip_gen: v7x
topology: tpu7x:2x2x1
jax: 0.10.0
libtpu: 0.0.40
codegen_flags: <defaults>
</compile_context>

<pallas_src>
import jax
import jax.numpy as jnp
from jax import lax
from jax.experimental import pallas as pl
from jax.experimental.pallas import tpu as pltpu


def _round_up(n, m):
    return ((n + m - 1) // m) * m


def _pick_tile(n, candidates):
    """Largest tile from `candidates` that divides n (n is a multiple of 128)."""
    for t in candidates:
        if n % t == 0:
            return t
    return 128


# ---------------------------------------------------------------------------
# Stage 1 (row x K tiled): hw2 = relu((adj @ x) @ W1) @ W2_pad
#   acc_ref accumulates (adj @ x) over the K axis; the (cheap) weight matmuls
#   run once per row tile at the last K step.
# ---------------------------------------------------------------------------
def _encode1_kernel(adj_ref, x_ref, w1_ref, w2_ref, hw2_ref, acc_ref):
    k = pl.program_id(1)

    @pl.when(k == 0)
    def _():
        acc_ref[...] = jnp.zeros_like(acc_ref)

    # bf16 x bf16 -> f32 accumulate on the MXU.
    acc_ref[...] += jnp.dot(adj_ref[...], x_ref[...],
                            preferred_element_type=jnp.float32)       # (TM, F)

    @pl.when(k == pl.num_programs(1) - 1)
    def _():
        ax = acc_ref[...].astype(jnp.bfloat16)
        h1 = jnp.dot(ax, w1_ref[...],
                     preferred_element_type=jnp.float32)              # (TM, H)
        h1 = jnp.maximum(h1, 0.0).astype(jnp.bfloat16)
        hw2 = jnp.dot(h1, w2_ref[...],
                      preferred_element_type=jnp.float32)             # (TM, Epad)
        hw2_ref[...] = hw2.astype(hw2_ref.dtype)


# ---------------------------------------------------------------------------
# Stage 2 (row x K tiled): emb = l2_normalize(adj @ hw2, dim=1)
#   Emits an f32 slab (returned to the caller) and a bf16 slab (decoder input).
# ---------------------------------------------------------------------------
def _encode2_kernel(adj_ref, hw2_ref, emb_f32_ref, emb_b16_ref, acc_ref):
    k = pl.program_id(1)

    @pl.when(k == 0)
    def _():
        acc_ref[...] = jnp.zeros_like(acc_ref)

    acc_ref[...] += jnp.dot(adj_ref[...], hw2_ref[...],
                            preferred_element_type=jnp.float32)       # (TM, Epad)

    @pl.when(k == pl.num_programs(1) - 1)
    def _():
        h2 = acc_ref[...]
        sumsq = jnp.sum(h2 * h2, axis=1, keepdims=True)
        # PyTorch F.normalize clamp_min(eps=1e-12): clamp the squared sum with
        # eps^2 and use rsqrt (EUP) + multiply instead of sqrt + divide.
        emb = h2 * lax.rsqrt(jnp.maximum(sumsq, 1e-24))
        emb_f32_ref[...] = emb
        emb_b16_ref[...] = emb.astype(emb_b16_ref.dtype)


# ---------------------------------------------------------------------------
# Stage 3 ((i, j) tiled): A_pred[i, j] = sigmoid(emb_i @ emb_j^T)
# ---------------------------------------------------------------------------
def _decode_kernel(zi_ref, zj_ref, a_ref):
    # Contract axis 1 of both bf16 operands -> no explicit transpose.
    logits = lax.dot_general(zi_ref[...], zj_ref[...],
                             (((1,), (1,)), ((), ())),
                             preferred_element_type=jnp.float32)      # (TM, TN)
    e = jnp.exp(-logits)                                              # EUP
    # logits are bounded in [-1, 1] (unit-norm rows) -> well conditioned;
    # approx reciprocal keeps the divide off the VALU.
    a_ref[...] = pl.reciprocal(1.0 + e, approx=True).astype(a_ref.dtype)


def gae_forward(x, adj, w1, w2, *, a_pred_dtype=jnp.bfloat16):
    N, F = x.shape
    H = w1.shape[1]
    E = w2.shape[1]
    Epad = _round_up(max(E, 128), 128)            # lane-dense embedding slab

    # Pad N to a multiple of 128 so every tile is (8,128)-aligned and the
    # grid pipelines; padded rows/cols are zero and are sliced off at the end.
    Np = _round_up(N, 128)
    TM = _pick_tile(Np, (512, 256, 128))          # row tile (parallel axis)
    TK = _pick_tile(Np, (1024, 512, 256, 128))    # K tile (arbitrary axis)
    TN = TM

    # bf16 streamed operands: halves dominant HBM traffic and VMEM footprint.
    adj_b = jnp.pad(adj, ((0, Np - N), (0, Np - N))).astype(jnp.bfloat16)
    x_b = jnp.pad(x, ((0, Np - N), (0, 0))).astype(jnp.bfloat16)
    w1_b = w1.astype(jnp.bfloat16)
    # Zero-pad W2 on the output dim: padded embedding columns stay exactly 0,
    # so the L2 norm and the decode dot products are unchanged.
    w2_b = jnp.pad(w2, ((0, 0), (0, Epad - E))).astype(jnp.bfloat16)

    row_grid = Np // TM
    k_grid = Np // TK
    enc_params = pltpu.CompilerParams(
        dimension_semantics=("parallel", "arbitrary"))

    # ---- stage 1: hw2 = relu((adj @ x) @ W1) @ W2 ---------------------------
    hw2 = pl.pallas_call(
        _encode1_kernel,
        out_shape=jax.ShapeDtypeStruct((Np, Epad), jnp.bfloat16),
        grid=(row_grid, k_grid),
        in_specs=[
            pl.BlockSpec((TM, TK), lambda i, k: (i, k)),      # adj tile (bf16)
            pl.BlockSpec((TK, F), lambda i, k: (k, 0)),       # x K-tile (bf16)
            pl.BlockSpec((F, H), lambda i, k: (0, 0)),        # W1 (bf16)
            pl.BlockSpec((H, Epad), lambda i, k: (0, 0)),     # W2 padded (bf16)
        ],
        out_specs=pl.BlockSpec((TM, Epad), lambda i, k: (i, 0)),
        scratch_shapes=[pltpu.VMEM((TM, F), jnp.float32)],
        compiler_params=enc_params,
        cost_estimate=pl.CostEstimate(
            flops=2 * Np * Np * F + 2 * Np * F * H + 2 * Np * H * Epad,
            transcendentals=0,
            bytes_accessed=2 * Np * Np + 2 * Np * F + 2 * F * H
                           + 2 * H * Epad + 2 * Np * Epad),
    )(adj_b, x_b, w1_b, w2_b)

    # ---- stage 2: emb = l2_normalize(adj @ hw2) -----------------------------
    # NOTE: hw2 is round-tripped in bf16; the stage-2 contraction is bf16 on
    # the MXU either way, covered by the loosened self-test tolerance.
    emb_f32, emb_b16 = pl.pallas_call(
        _encode2_kernel,
        out_shape=(jax.ShapeDtypeStruct((Np, Epad), jnp.float32),
                   jax.ShapeDtypeStruct((Np, Epad), jnp.bfloat16)),
        grid=(row_grid, k_grid),
        in_specs=[
            pl.BlockSpec((TM, TK), lambda i, k: (i, k)),      # adj tile (bf16)
            pl.BlockSpec((TK, Epad), lambda i, k: (k, 0)),    # hw2 K-tile
        ],
        out_specs=[pl.BlockSpec((TM, Epad), lambda i, k: (i, 0)),
                   pl.BlockSpec((TM, Epad), lambda i, k: (i, 0))],
        scratch_shapes=[pltpu.VMEM((TM, Epad), jnp.float32)],
        compiler_params=enc_params,
        cost_estimate=pl.CostEstimate(
            flops=2 * Np * Np * Epad + 4 * Np * Epad,
            transcendentals=Np,
            bytes_accessed=2 * Np * Np + 2 * Np * Epad + 6 * Np * Epad),
    )(adj_b, hw2)

    # ---- stage 3: A_pred = sigmoid(emb @ emb^T) -----------------------------
    a_itemsize = jnp.dtype(a_pred_dtype).itemsize
    a_pred = pl.pallas_call(
        _decode_kernel,
        out_shape=jax.ShapeDtypeStruct((Np, Np), a_pred_dtype),
        grid=(row_grid, Np // TN),
        in_specs=[
            pl.BlockSpec((TM, Epad), lambda i, j: (i, 0)),
            pl.BlockSpec((TN, Epad), lambda i, j: (j, 0)),
        ],
        out_specs=pl.BlockSpec((TM, TN), lambda i, j: (i, j)),
        compiler_params=pltpu.CompilerParams(
            dimension_semantics=("parallel", "parallel")),
        cost_estimate=pl.CostEstimate(
            flops=2 * Np * Np * Epad,
            transcendentals=Np * Np,
            bytes_accessed=a_itemsize * Np * Np + 4 * Np * Epad),
    )(emb_b16, emb_b16)

    return a_pred[:N, :N], emb_f32[:N, :E]


def reference_forward(x, adj, w1, w2):
    h1 = jnp.maximum(adj @ (x @ w1), 0.0)
    h2 = adj @ (h1 @ w2)
    norm = jnp.sqrt(jnp.sum(h2 * h2, axis=1, keepdims=True))
    emb = h2 / jnp.maximum(norm, 1e-12)
    return jax.nn.sigmoid(emb @ emb.T), emb


if __name__ == "__main__":
    # Small synthetic problem: N nodes, input_dim features, hidden, embedding.
    N, input_dim, hidden_size, embedding_dim = 128, 32, 64, 16

    key = jax.random.PRNGKey(0)
    kx, kadj, kw1, kw2 = jax.random.split(key, 4)

    x = jax.random.normal(kx, (N, input_dim), dtype=jnp.float32)

    # Symmetric, row-normalized adjacency (typical GCN preprocessing).
    a = (jax.random.uniform(kadj, (N, N)) < 0.1).astype(jnp.float32)
    a = jnp.maximum(a, a.T) + jnp.eye(N, dtype=jnp.float32)
    adj = a / jnp.sum(a, axis=1, keepdims=True)

    # Deterministic glorot-uniform-style weight init (matches GCN param shapes).
    def glorot(k, fan_in, fan_out):
        lim = jnp.sqrt(6.0 / (fan_in + fan_out))
        return jax.random.uniform(k, (fan_in, fan_out), jnp.float32, -lim, lim)

    w1 = glorot(kw1, input_dim, hidden_size)
    w2 = glorot(kw2, hidden_size, embedding_dim)

    a_pred, embedding = gae_forward(x, adj, w1, w2)
    jax.block_until_ready((a_pred, embedding))

    # Sanity-check against a pure-JAX f32 reference.  Tolerances are loosened
    # because the MXU operands and the A_pred output slab are bf16.
    a_ref, e_ref = reference_forward(x, adj, w1, w2)
    assert a_pred.shape == (N, N) and embedding.shape == (N, embedding_dim)
    assert jnp.allclose(a_pred.astype(jnp.float32), a_ref, atol=5e-2, rtol=5e-2)
    assert jnp.allclose(embedding, e_ref, atol=5e-2, rtol=5e-2)

    print("KERNEL_OK")
</pallas_src>

<mosaic_0001>
module attributes {stable_mosaic.version = 11 : i64} {
  func.func @_encode1_kernel(%arg0: i32, %arg1: i32, %arg2: memref<128x128xbf16, #tpu.memory_space<vmem>>, %arg3: memref<128x32xbf16, #tpu.memory_space<vmem>>, %arg4: memref<32x64xbf16, #tpu.memory_space<vmem>>, %arg5: memref<64x128xbf16, #tpu.memory_space<vmem>>, %arg6: memref<128x128xbf16, #tpu.memory_space<vmem>>, %arg7: memref<128x32xf32, #tpu.memory_space<vmem>>) attributes {dimension_semantics = [#tpu.dimension_semantics<parallel>, #tpu.dimension_semantics<arbitrary>], iteration_bounds = array<i64: 1, 1>, scalar_prefetch = 0 : i64, scratch_operands = 1 : i64, tpu.core_type = #tpu.core_type<tc>, window_params = [{transform_indices = @transform_0, window_bounds = array<i64: 128, 128>}, {transform_indices = @transform_1, window_bounds = array<i64: 128, 32>}, {pipeline_mode = #tpu.pipeline_mode<synchronous>, transform_indices = @transform_2, window_bounds = array<i64: 32, 64>}, {pipeline_mode = #tpu.pipeline_mode<synchronous>, transform_indices = @transform_3, window_bounds = array<i64: 64, 128>}, {transform_indices = @transform_4, window_bounds = array<i64: 128, 128>}]} {
    %c0_i32 = arith.constant 0 : i32
    %0 = arith.cmpi eq, %arg1, %c0_i32 : i32
    %1 = arith.extui %0 : i1 to i32
    %c0_i32_0 = arith.constant 0 : i32
    %2 = arith.cmpi ne, %1, %c0_i32_0 : i32
    scf.if %2 {
      %cst_10 = arith.constant 0.000000e+00 : f32
      %12 = vector.broadcast %cst_10 : f32 to vector<128x32xf32>
      %c0_11 = arith.constant 0 : index
      %c0_12 = arith.constant 0 : index
      %13 = vector.load %arg7[%c0_11, %c0_12] : memref<128x32xf32, #tpu.memory_space<vmem>>, vector<128x32xf32>
      tpu.vector_store %arg7[%c0_11, %c0_12], %12 {strides = array<i32>} : memref<128x32xf32, #tpu.memory_space<vmem>>, vector<128x32xf32>,
    } else {
    }
    %c0 = arith.constant 0 : index
    %c0_1 = arith.constant 0 : index
    %3 = vector.load %arg7[%c0, %c0_1] : memref<128x32xf32, #tpu.memory_space<vmem>>, vector<128x32xf32>
    %c0_2 = arith.constant 0 : index
    %c0_3 = arith.constant 0 : index
    %4 = vector.load %arg2[%c0_2, %c0_3] : memref<128x128xbf16, #tpu.memory_space<vmem>>, vector<128x128xbf16>
    %c0_4 = arith.constant 0 : index
    %c0_5 = arith.constant 0 : index
    %5 = vector.load %arg3[%c0_4, %c0_5] : memref<128x32xbf16, #tpu.memory_space<vmem>>, vector<128x32xbf16>
    %cst = arith.constant dense<0.000000e+00> : vector<128x32xf32>
    %6 = tpu.matmul %4, %5, %cst {dimension_numbers = #tpu.dot_dimension_numbers<[1], [0], [0], [1], [0, 0, 1, 1], [], []>} : vector<128x128xbf16>, vector<128x32xbf16>, vector<128x32xf32> -> vector<128x32xf32>
    %7 = arith.addf %3, %6 : vector<128x32xf32>
    %c0_6 = arith.constant 0 : index
    %c0_7 = arith.constant 0 : index
    %8 = vector.load %arg7[%c0_6, %c0_7] : memref<128x32xf32, #tpu.memory_space<vmem>>, vector<128x32xf32>
    tpu.vector_store %arg7[%c0_6, %c0_7], %7 {strides = array<i32>} : memref<128x32xf32, #tpu.memory_space<vmem>>, vector<128x32xf32>,
    %c0_i32_8 = arith.constant 0 : i32
    %9 = arith.cmpi eq, %arg1, %c0_i32_8 : i32
    %10 = arith.extui %9 : i1 to i32
    %c0_i32_9 = arith.constant 0 : i32
    %11 = arith.cmpi ne, %10, %c0_i32_9 : i32
    scf.if %11 {
      %c0_10 = arith.constant 0 : index
      %c0_11 = arith.constant 0 : index
      %12 = vector.load %arg7[%c0_10, %c0_11] : memref<128x32xf32, #tpu.memory_space<vmem>>, vector<128x32xf32>
      %13 = arith.truncf %12 : vector<128x32xf32> to vector<128x32xbf16>
      %c0_12 = arith.constant 0 : index
      %c0_13 = arith.constant 0 : index
      %14 = vector.load %arg4[%c0_12, %c0_13] : memref<32x64xbf16, #tpu.memory_space<vmem>>, vector<32x64xbf16>
      %cst_14 = arith.constant dense<0.000000e+00> : vector<128x64xf32>
      %15 = tpu.matmul %13, %14, %cst_14 {dimension_numbers = #tpu.dot_dimension_numbers<[1], [0], [0], [1], [0, 0, 1, 1], [], []>} : vector<128x32xbf16>, vector<32x64xbf16>, vector<128x64xf32> -> vector<128x64xf32>
      %cst_15 = arith.constant 0.000000e+00 : f32
      %16 = vector.broadcast %cst_15 : f32 to vector<128x64xf32>
      %17 = arith.maximumf %15, %16 : vector<128x64xf32>
      %18 = arith.truncf %17 : vector<128x64xf32> to vector<128x64xbf16>
      %c0_16 = arith.constant 0 : index
      %c0_17 = arith.constant 0 : index
      %19 = vector.load %arg5[%c0_16, %c0_17] : memref<64x128xbf16, #tpu.memory_space<vmem>>, vector<64x128xbf16>
      %cst_18 = arith.constant dense<0.000000e+00> : vector<128x128xf32>
      %20 = tpu.matmul %18, %19, %cst_18 {dimension_numbers = #tpu.dot_dimension_numbers<[1], [0], [0], [1], [0, 0, 1, 1], [], []>} : vector<128x64xbf16>, vector<64x128xbf16>, vector<128x128xf32> -> vector<128x128xf32>
      %21 = arith.truncf %20 : vector<128x128xf32> to vector<128x128xbf16>
      %c0_19 = arith.constant 0 : index
      %c0_20 = arith.constant 0 : index
      %22 = vector.load %arg6[%c0_19, %c0_20] : memref<128x128xbf16, #tpu.memory_space<vmem>>, vector<128x128xbf16>
      tpu.vector_store %arg6[%c0_19, %c0_20], %21 {strides = array<i32>} : memref<128x128xbf16, #tpu.memory_space<vmem>>, vector<128x128xbf16>,
    } else {
    }
    return
  }
  func.func @transform_0(%arg0: i32, %arg1: i32) -> (i32, i32) {
    %c0_i32 = arith.constant 0 : i32
    return %arg0, %arg1 : i32, i32
  }
  func.func @transform_1(%arg0: i32, %arg1: i32) -> (i32, i32) {
    %c0_i32 = arith.constant 0 : i32
    %c0_i32_0 = arith.constant 0 : i32
    return %arg1, %c0_i32 : i32, i32
  }
  func.func @transform_2(%arg0: i32, %arg1: i32) -> (i32, i32) {
    %c0_i32 = arith.constant 0 : i32
    %c0_i32_0 = arith.constant 0 : i32
    %c0_i32_1 = arith.constant 0 : i32
    return %c0_i32, %c0_i32_0 : i32, i32
  }
  func.func @transform_3(%arg0: i32, %arg1: i32) -> (i32, i32) {
    %c0_i32 = arith.constant 0 : i32
    %c0_i32_0 = arith.constant 0 : i32
    %c0_i32_1 = arith.constant 0 : i32
    return %c0_i32, %c0_i32_0 : i32, i32
  }
  func.func @transform_4(%arg0: i32, %arg1: i32) -> (i32, i32) {
    %c0_i32 = arith.constant 0 : i32
    %c0_i32_0 = arith.constant 0 : i32
    return %arg0, %c0_i32 : i32, i32
  }
}

</mosaic_0001>

<bundles_post_ra>
// kernel: tpu_custom_call.1
= control target key start
LH: loop header
LB: loop body
LE: loop exit
PB: predicated region body
PF: predicated region fallthrough
CT: control target
= control target key end

     0   :  { %9 = vsyncpa [#allocation4], 0  ;;  %s1235_s0 = inlined_call_operand.vmem [shape: bf16[128,128], index: 0, kind: input, shape index: {}]   ;;  %s1236_s1 = inlined_call_operand.vmem [shape: bf16[128,32], index: 1, kind: input, shape index: {}]   ;;  %s1237_s2 = inlined_call_operand.vmem [shape: bf16[32,64], index: 2, kind: input, shape index: {}]   ;;  %s1238_s3 = inlined_call_operand.hbm [shape: bf16[64,128], index: 3, kind: input, shape index: {}]   ;;  %s1239_s4 = inlined_call_operand.hbm [shape: bf16[128,128], index: 4, kind: output, shape index: {}]  }
   0x1   :  { %10 = vsyncpa [#allocation5], 0  ;;  %s1073_s15 = smov [#allocation3]   ;;  %s1025_s19 = scalar_lea.hbm %s1238_s3, 512 }
   0x2   :  { %s22_s16 = sshll.u32 %s1073_s15, 4  ;;  %p1026_p0 = scmp.ne.s32.totalorder %s1238_s3, %s1025_s19  ;;  %s23_s16 = int_to_ptr.vmem [resolvable:$true] %s22_s16 }
   0x3   :  { %p1029_p1 = scmp.lt.u32.totalorder %s1025_s19, %s1238_s3 }
   0x5   :  { %p1031_p2 = pnand %p1029_p1, %p1026_p0 }
   0x7   :  { %1034 = shalt.err (!%p1031_p2)
}
   0x8   :  { %s1035_s24 = scalar_lea.vmem %s23_s16, 512  ;;  %p1040_p4 = scmp.lt.s32.totalorder %s23_s16, %s23_s16 }
   0x9   :  { %p1036_p3 = scmp.ne.s32.totalorder %s23_s16, %s1035_s24  ;;  %p1041_p5 = scmp.lt.s32.totalorder %s1035_s24, %s1035_s24 }
   0xb   :  { %p1042_p6 = por %p1041_p5, %p1040_p4 }
   0xd   :  { %p1043_p7 = pnand %p1042_p6, %p1036_p3 }
   0xf   :  { %1046 = shalt.err (!%p1043_p7)
}
  0x10   :  { %s1074_s25 = smov 64   ;;  %s1075_s26 = smov 4  }
  0x11   :  { %28 = dma.hbm_to_vmem [thread:$0]  %s1238_s3, 512, %s23_s16, [#allocation4], %s1074_s25, %s1074_s25, %s1075_s26  }
  0x12   :  { %1069 = dma.done.wait [#allocation4], 512  }
  0x13   :  { %1070 = vsyncadd [#allocation4], 4294966784  ;;  %vm37_vm0 = vcmask 261120   ;;  %v1076_v0 = vmov 0.0   ;;  %v1003_v1 = vld [vmem:[%s1236_s1] sm:$0xff]   ;;  %v1004_v2 = vld [vmem:[%s1236_s1 + $0x8] sm:$0xff]  }
  0x14   :  { %40 = vst.msk [vmem:[#allocation2 + $0x10] sm:$0xff] %vm37_vm0, %v1076_v0  ;;  %38 = vst.msk [vmem:[#allocation2] sm:$0xff] %vm37_vm0, %v1076_v0  ;;  %922 = vmatprep.subr.bf16.mxu0 %v1003_v1  ;;  %v1005_v3 = vld [vmem:[%s1236_s1 + $0x10] sm:$0xff]   ;;  %v1006_v4 = vld [vmem:[%s1236_s1 + $0x18] sm:$0xff]   ;;  %vm548_vm1 = vcmask 523264  }
  0x15   :  { %39 = vst.msk [vmem:[#allocation2 + $0x8] sm:$0xff] %vm37_vm0, %v1076_v0  ;;  %41 = vst.msk [vmem:[#allocation2 + $0x18] sm:$0xff] %vm37_vm0, %v1076_v0  ;;  %923 = vmatpush3.bf16.msra.mxu0 %v1003_v1  ;;  %v1011_v5 = vld [vmem:[%s1235_s0] sm:$0xff]   ;;  %v1008_v7 = vld [vmem:[%s1236_s1 + $0x28] sm:$0xff]  }
  0x16   :  { %42 = vst.msk [vmem:[#allocation2 + $0x20] sm:$0xff] %vm37_vm0, %v1076_v0  ;;  %43 = vst.msk [vmem:[#allocation2 + $0x28] sm:$0xff] %vm37_vm0, %v1076_v0  ;;  %924 = vmatprep.subr.bf16.mxu0 %v1004_v2  ;;  %938 = vmatprep.mubr.bf16.mxu0 %v1011_v5  ;;  %v1007_v6 = vld [vmem:[%s1236_s1 + $0x20] sm:$0xff]   ;;  %v1009_v8 = vld [vmem:[%s1236_s1 + $0x30] sm:$0xff]  }
  0x17   :  { %44 = vst.msk [vmem:[#allocation2 + $0x30] sm:$0xff] %vm37_vm0, %v1076_v0  ;;  %45 = vst.msk [vmem:[#allocation2 + $0x38] sm:$0xff] %vm37_vm0, %v1076_v0  ;;  %v1010_v9 = vld [vmem:[%s1236_s1 + $0x38] sm:$0xff]   ;;  %v1012_v10 = vld [vmem:[%s1235_s0 + $0x8] sm:$0xff]  }
  0x18   :  { %46 = vst.msk [vmem:[#allocation2 + $0x40] sm:$0xff] %vm37_vm0, %v1076_v0  ;;  %47 = vst.msk [vmem:[#allocation2 + $0x48] sm:$0xff] %vm37_vm0, %v1076_v0  ;;  %v1013_v11 = vld [vmem:[%s1235_s0 + $0x10] sm:$0xff]   ;;  %v1014_v12 = vld [vmem:[%s1235_s0 + $0x18] sm:$0xff]  }
  0x19   :  { %48 = vst.msk [vmem:[#allocation2 + $0x50] sm:$0xff] %vm37_vm0, %v1076_v0  ;;  %49 = vst.msk [vmem:[#allocation2 + $0x58] sm:$0xff] %vm37_vm0, %v1076_v0  ;;  %925 = vmatpush3.bf16.msra.mxu0 %v1004_v2  ;;  %v1015_v13 = vld [vmem:[%s1235_s0 + $0x20] sm:$0xff]   ;;  %v1016_v14 = vld [vmem:[%s1235_s0 + $0x28] sm:$0xff]  }
  0x1a   :  { %50 = vst.msk [vmem:[#allocation2 + $0x60] sm:$0xff] %vm37_vm0, %v1076_v0  ;;  %51 = vst.msk [vmem:[#allocation2 + $0x68] sm:$0xff] %vm37_vm0, %v1076_v0  ;;  %926 = vmatprep.subr.bf16.mxu0 %v1005_v3  ;;  %v1017_v15 = vld [vmem:[%s1235_s0 + $0x30] sm:$0xff]   ;;  %v1018_v16 = vld [vmem:[%s1235_s0 + $0x38] sm:$0xff]   ;;  %s1077_s0 = smov [#allocation6]  }
  0x1b   :  { %52 = vst.msk [vmem:[#allocation2 + $0x70] sm:$0xff] %vm37_vm0, %v1076_v0  ;;  %53 = vst.msk [vmem:[#allocation2 + $0x78] sm:$0xff] %vm37_vm0, %v1076_v0  ;;  %v1019_v17 = vld [vmem:[%s1237_s2] sm:$0xff]   ;;  %v1020_v18 = vld [vmem:[%s1237_s2 + $0x8] sm:$0xff]   ;;  %s755_s2 = sshll.u32 %s1077_s0, 4  ;;  %s756_s2 = int_to_ptr.vmem [resolvable:$true] %s755_s2 }
  0x1c   :  { %954 = vmatprep.subr.bf16.mxu1 %v1019_v17  ;;  %v1021_v19 = vld [vmem:[#allocation3] sm:$0xff]   ;;  %v56_v20 = vld [vmem:[#allocation2 + $0x10] sm:$0xff]  ;;  %v57_v23 = vld [vmem:[#allocation2 + $0x18] sm:$0xff]  ;;  %s1047_s12 = scalar_lea.vmem %s756_s2, 1024  ;;  %p1052_p9 = scmp.lt.s32.totalorder %s756_s2, %s756_s2 }
  0x1d   :  { %927 = vmatpush3.bf16.msra.mxu0 %v1005_v3  ;;  %955 = vmatpush3.bf16.msra.mxu1 %v1019_v17  ;;  %v54_v21 = vld [vmem:[#allocation2] sm:$0xff]  ;;  %v55_v26 = vld [vmem:[#allocation2 + $0x8] sm:$0xff]  ;;  %v1023_v62 = vld [vmem:[#allocation3 + $0x10] sm:$0xff]   ;;  %p1048_p8 = scmp.ne.s32.totalorder %s756_s2, %s1047_s12  ;;  %p1053_p10 = scmp.lt.s32.totalorder %s1047_s12, %s1047_s12 }
  0x1e   :  { %928 = vmatprep.subr.bf16.mxu0 %v1006_v4  ;;  %956 = vmatprep.subr.bf16.mxu1 %v1020_v18  ;;  %v60_v32 = vld [vmem:[#allocation2 + $0x30] sm:$0xff]  ;;  %v58_v33 = vld [vmem:[#allocation2 + $0x20] sm:$0xff]  ;;  %v61_v35 = vld [vmem:[#allocation2 + $0x38] sm:$0xff] }
  0x1f   :  { %v59_v38 = vld [vmem:[#allocation2 + $0x28] sm:$0xff]  ;;  %v62_v50 = vld [vmem:[#allocation2 + $0x40] sm:$0xff]  ;;  %p1054_p11 = por %p1053_p10, %p1052_p9 }
  0x20   :  { %v64_v47 = vld [vmem:[#allocation2 + $0x50] sm:$0xff]  ;;  %v1022_v52 = vld [vmem:[#allocation3 + $0x8] sm:$0xff]   ;;  %v65_v54 = vld [vmem:[#allocation2 + $0x58] sm:$0xff] }
  0x21   :  { %929 = vmatpush3.bf16.msra.mxu0 %v1006_v4  ;;  %957 = vmatpush3.bf16.msra.mxu1 %v1020_v18  ;;  %v63_v57 = vld [vmem:[#allocation2 + $0x48] sm:$0xff]  ;;  %p1055_p12 = pnand %p1054_p11, %p1048_p8 }
  0x22   :  { %930 = vmatprep.subr.bf16.mxu0 %v1007_v6  ;;  %974 = vmatprep.subr.bf16.mxu1 %v1021_v19  ;;  %v68_v3 = vld [vmem:[#allocation2 + $0x70] sm:$0xff] }
  0x25   :  { %931 = vmatpush3.bf16.msra.mxu0 %v1007_v6  ;;  %v66_v6 = vld [vmem:[#allocation2 + $0x60] sm:$0xff] }
  0x26   :  { %932 = vmatprep.subr.bf16.mxu0 %v1008_v7 }
  0x29   :  { %933 = vmatpush3.bf16.msra.mxu0 %v1008_v7 }
  0x2a   :  { %934 = vmatprep.subr.bf16.mxu0 %v1009_v8 }
  0x2d   :  { %935 = vmatpush3.bf16.msra.mxu0 %v1009_v8 }
  0x2e   :  { %936 = vmatprep.subr.bf16.mxu0 %v1010_v9 }
  0x31   :  { %937 = vmatpush3.bf16.msra.mxu0 %v1010_v9  ;;  %v69_v9 = vld [vmem:[#allocation2 + $0x78] sm:$0xff] }
  0x34   :  { %939 = vmatmul.mubr.bf16.vlgmr.msra.gmra.mrb[0].mxu0 %v1012_v10 }
  0x35   :  { %942 = vmatprep.mubr.bf16.mxu0 %v1013_v11 }
  0x3c   :  { %943 = vmatmul.mubr.bf16.gmra.mrb[4].mxu0 %v1014_v12  ;;  %v67_v12 = vld [vmem:[#allocation2 + $0x68] sm:$0xff] }
  0x3d   :  { %946 = vmatprep.mubr.bf16.mxu0 %v1015_v13 }
  0x44   :  { %947 = vmatmul.mubr.bf16.gmra.mrb[8].mxu0 %v1016_v14 }
  0x45   :  { %950 = vmatprep.mubr.bf16.mxu0 %v1017_v15 }
  0x4c   :  { %951 = vmatmul.mubr.bf16.gmra.mrb[12].mxu0 %v1018_v16 }
 0x107   :  { %v940_v22 = vpop.f32.mrb[0].mxu0 }
 0x108   :  { %v297_v24 = vadd.f32 %v940_v22, %v56_v20  ;;  %v232_v25 = vpop.f32.mrb[1].mxu0 }
 0x109   :  { %v295_v27 = vadd.f32 %v232_v25, %v54_v21  ;;  %v941_v28 = vpop.f32.mrb[2].mxu0 }
 0x10a   :  { %314 = vst.msk [vmem:[#allocation2 + $0x10] sm:$0xff] %vm37_vm0, %v297_v24  ;;  %v298_v29 = vadd.f32 %v941_v28, %v57_v23  ;;  %v235_v30 = vpop.f32.mrb[3].mxu0 }
 0x10b   :  { %312 = vst.msk [vmem:[#allocation2] sm:$0xff] %vm37_vm0, %v295_v27  ;;  %v296_v31 = vadd.f32 %v235_v30, %v55_v26  ;;  %v1024_v30 = vld [vmem:[#allocation3 + $0x18] sm:$0xff]  }
 0x10c   :  { %315 = vst.msk [vmem:[#allocation2 + $0x18] sm:$0xff] %vm37_vm0, %v298_v29 }
 0x10d   :  { %313 = vst.msk [vmem:[#allocation2 + $0x8] sm:$0xff] %vm37_vm0, %v296_v31 }
 0x10f   :  { %v944_v34 = vpop.f32.mrb[4].mxu0 }
 0x110   :  { %v301_v36 = vadd.f32 %v944_v34, %v60_v32  ;;  %v248_v37 = vpop.f32.mrb[5].mxu0 }
 0x111   :  { %v299_v39 = vadd.f32 %v248_v37, %v58_v33  ;;  %v945_v40 = vpop.f32.mrb[6].mxu0  ;;  %v333_v49 = vld [vmem:[#allocation2 + $0x10] sm:$0xff] }
 0x112   :  { %318 = vst.msk [vmem:[#allocation2 + $0x30] sm:$0xff] %vm37_vm0, %v301_v36  ;;  %v302_v41 = vadd.f32 %v945_v40, %v61_v35  ;;  %v251_v42 = vpop.f32.mrb[7].mxu0  ;;  %v331_v45 = vld [vmem:[#allocation2] sm:$0xff] }
 0x113   :  { %316 = vst.msk [vmem:[#allocation2 + $0x20] sm:$0xff] %vm37_vm0, %v299_v39  ;;  %v300_v43 = vadd.f32 %v251_v42, %v59_v38  ;;  %v334_v44 = vld [vmem:[#allocation2 + $0x18] sm:$0xff] }
 0x114   :  { %319 = vst.msk [vmem:[#allocation2 + $0x38] sm:$0xff] %vm37_vm0, %v302_v41  ;;  %v332_v46 = vld [vmem:[#allocation2 + $0x8] sm:$0xff]  ;;  %v348_v51 = vpack.c.bf16 %v334_v44, %v333_v49 }
 0x115   :  { %317 = vst.msk [vmem:[#allocation2 + $0x28] sm:$0xff] %vm37_vm0, %v300_v43  ;;  %v347_v48 = vpack.c.bf16 %v332_v46, %v331_v45 }
 0x117   :  { %v948_v53 = vpop.f32.mrb[8].mxu0  ;;  %958 = vmatprep.mubr.msk.bf16.mxu1 %vm37_vm0, %v347_v48 }
 0x118   :  { %v305_v55 = vadd.f32 %v948_v53, %v64_v47  ;;  %v264_v56 = vpop.f32.mrb[9].mxu0  ;;  %959 = vmatmul.mubr.msk.bf16.vlgmr.msra.gmra.mrb[0].mxu1 %vm37_vm0, %v348_v51 }
 0x119   :  { %v303_v58 = vadd.f32 %v264_v56, %v62_v50  ;;  %v949_v59 = vpop.f32.mrb[10].mxu0  ;;  %975 = vmatpush3.bf16.msra.mxu1 %v1021_v19  ;;  %v337_v5 = vld [vmem:[#allocation2 + $0x30] sm:$0xff] }
 0x11a   :  { %322 = vst.msk [vmem:[#allocation2 + $0x50] sm:$0xff] %vm37_vm0, %v305_v55  ;;  %v306_v60 = vadd.f32 %v949_v59, %v65_v54  ;;  %v267_v61 = vpop.f32.mrb[11].mxu0  ;;  %976 = vmatprep.subr.bf16.mxu1 %v1022_v52  ;;  %v335_v1 = vld [vmem:[#allocation2 + $0x20] sm:$0xff] }
 0x11b   :  { %320 = vst.msk [vmem:[#allocation2 + $0x40] sm:$0xff] %vm37_vm0, %v303_v58  ;;  %v304_v63 = vadd.f32 %v267_v61, %v63_v57  ;;  %v338_v0 = vld [vmem:[#allocation2 + $0x38] sm:$0xff] }
 0x11c   :  { %323 = vst.msk [vmem:[#allocation2 + $0x58] sm:$0xff] %vm37_vm0, %v306_v60  ;;  %v336_v2 = vld [vmem:[#allocation2 + $0x28] sm:$0xff]  ;;  %v350_v7 = vpack.c.bf16 %v338_v0, %v337_v5 }
 0x11d   :  { %321 = vst.msk [vmem:[#allocation2 + $0x48] sm:$0xff] %vm37_vm0, %v304_v63  ;;  %v349_v4 = vpack.c.bf16 %v336_v2, %v335_v1  ;;  %977 = vmatpush3.bf16.msra.mxu1 %v1022_v52 }
 0x11e   :  { %978 = vmatprep.subr.bf16.mxu1 %v1023_v62 }
 0x11f   :  { %v952_v8 = vpop.f32.mrb[12].mxu0  ;;  %962 = vmatprep.mubr.msk.bf16.mxu1 %vm37_vm0, %v349_v4 }
 0x120   :  { %v309_v10 = vadd.f32 %v952_v8, %v68_v3  ;;  %v280_v11 = vpop.f32.mrb[13].mxu0  ;;  %963 = vmatmul.mubr.msk.bf16.gmra.mrb[4].mxu1 %vm37_vm0, %v350_v7 }
 0x121   :  { %v307_v13 = vadd.f32 %v280_v11, %v66_v6  ;;  %v953_v14 = vpop.f32.mrb[14].mxu0  ;;  %979 = vmatpush3.bf16.msra.mxu1 %v1023_v62  ;;  %v341_v22 = vld [vmem:[#allocation2 + $0x50] sm:$0xff] }
 0x122   :  { %326 = vst.msk [vmem:[#allocation2 + $0x70] sm:$0xff] %vm37_vm0, %v309_v10  ;;  %v310_v15 = vadd.f32 %v953_v14, %v69_v9  ;;  %v283_v16 = vpop.f32.mrb[15].mxu0  ;;  %v339_v19 = vld [vmem:[#allocation2 + $0x40] sm:$0xff]  ;;  %980 = vmatprep.subr.bf16.mxu1 %v1024_v30 }
 0x123   :  { %324 = vst.msk [vmem:[#allocation2 + $0x60] sm:$0xff] %vm37_vm0, %v307_v13  ;;  %v308_v17 = vadd.f32 %v283_v16, %v67_v12  ;;  %v342_v18 = vld [vmem:[#allocation2 + $0x58] sm:$0xff] }
 0x124   :  { %327 = vst.msk [vmem:[#allocation2 + $0x78] sm:$0xff] %vm37_vm0, %v310_v15  ;;  %v340_v20 = vld [vmem:[#allocation2 + $0x48] sm:$0xff]  ;;  %v352_v23 = vpack.c.bf16 %v342_v18, %v341_v22 }
 0x125   :  { %325 = vst.msk [vmem:[#allocation2 + $0x68] sm:$0xff] %vm37_vm0, %v308_v17  ;;  %v351_v21 = vpack.c.bf16 %v340_v20, %v339_v19  ;;  %981 = vmatpush3.bf16.msra.mxu1 %v1024_v30 }
 0x127   :  { %966 = vmatprep.mubr.msk.bf16.mxu1 %vm37_vm0, %v351_v21 }
 0x128   :  { %967 = vmatmul.mubr.msk.bf16.gmra.mrb[8].mxu1 %vm37_vm0, %v352_v23 }
 0x129   :  { %v345_v28 = vld [vmem:[#allocation2 + $0x70] sm:$0xff] }
 0x12a   :  { %v343_v25 = vld [vmem:[#allocation2 + $0x60] sm:$0xff] }
 0x12b   :  { %v346_v24 = vld [vmem:[#allocation2 + $0x78] sm:$0xff] }
 0x12c   :  { %v344_v26 = vld [vmem:[#allocation2 + $0x68] sm:$0xff]  ;;  %v354_v29 = vpack.c.bf16 %v346_v24, %v345_v28 }
 0x12d   :  { %v353_v27 = vpack.c.bf16 %v344_v26, %v343_v25 }
 0x12f   :  { %970 = vmatprep.mubr.msk.bf16.mxu1 %vm37_vm0, %v353_v27 }
 0x130   :  { %971 = vmatmul.mubr.msk.bf16.gmra.mrb[12].mxu1 %vm37_vm0, %v354_v29 }
 0x1eb   :  { %v960_v31 = vpop.f32.mrb[0].mxu1 }
 0x1ec   :  { %v429_v32 = vpop.f32.mrb[1].mxu1  ;;  %v494_v34 = vmax.f32 %v960_v31, 0.0 }
 0x1ed   :  { %v961_v33 = vpop.f32.mrb[2].mxu1  ;;  %v492_v37 = vmax.f32 %v429_v32, 0.0 }
 0x1ee   :  { %v495_v35 = vmax.f32 %v961_v33, 0.0  ;;  %v432_v36 = vpop.f32.mrb[3].mxu1 }
 0x1ef   :  { %v493_v38 = vmax.f32 %v432_v36, 0.0 }
 0x1f0   :  { %v509_v39 = vpack.c.bf16 %v495_v35, %v494_v34 }
 0x1f1   :  { %v508_v40 = vpack.c.bf16 %v493_v38, %v492_v37 }
 0x1f3   :  { %v964_v41 = vpop.f32.mrb[4].mxu1  ;;  %982 = vmatprep.mubr.msk.bf16.mxu1 %vm548_vm1, %v508_v40 }
 0x1f4   :  { %v445_v42 = vpop.f32.mrb[5].mxu1  ;;  %983 = vmatmul.mubr.msk.bf16.vlgmr.msra.gmra.mrb[16].mxu1 %vm548_vm1, %v509_v39  ;;  %v498_v44 = vmax.f32 %v964_v41, 0.0 }
 0x1f5   :  { %v965_v43 = vpop.f32.mrb[6].mxu1  ;;  %v496_v47 = vmax.f32 %v445_v42, 0.0 }
 0x1f6   :  { %v499_v45 = vmax.f32 %v965_v43, 0.0  ;;  %v448_v46 = vpop.f32.mrb[7].mxu1 }
 0x1f7   :  { %v497_v48 = vmax.f32 %v448_v46, 0.0 }
 0x1f8   :  { %v511_v49 = vpack.c.bf16 %v499_v45, %v498_v44 }
 0x1f9   :  { %v510_v50 = vpack.c.bf16 %v497_v48, %v496_v47 }
 0x1fb   :  { %v968_v51 = vpop.f32.mrb[8].mxu1  ;;  %986 = vmatprep.mubr.msk.bf16.mxu1 %vm548_vm1, %v510_v50 }
 0x1fc   :  { %v461_v52 = vpop.f32.mrb[9].mxu1  ;;  %987 = vmatmul.mubr.msk.bf16.gmra.mrb[20].mxu1 %vm548_vm1, %v511_v49  ;;  %v502_v54 = vmax.f32 %v968_v51, 0.0 }
 0x1fd   :  { %v969_v53 = vpop.f32.mrb[10].mxu1  ;;  %v500_v57 = vmax.f32 %v461_v52, 0.0 }
 0x1fe   :  { %v503_v55 = vmax.f32 %v969_v53, 0.0  ;;  %v464_v56 = vpop.f32.mrb[11].mxu1 }
 0x1ff   :  { %v501_v58 = vmax.f32 %v464_v56, 0.0 }
 0x200   :  { %v513_v59 = vpack.c.bf16 %v503_v55, %v502_v54 }
 0x201   :  { %v512_v60 = vpack.c.bf16 %v501_v58, %v500_v57 }
 0x203   :  { %v972_v61 = vpop.f32.mrb[12].mxu1  ;;  %990 = vmatprep.mubr.msk.bf16.mxu1 %vm548_vm1, %v512_v60 }
 0x204   :  { %v477_v62 = vpop.f32.mrb[13].mxu1  ;;  %991 = vmatmul.mubr.msk.bf16.gmra.mrb[24].mxu1 %vm548_vm1, %v513_v59  ;;  %v506_v0 = vmax.f32 %v972_v61, 0.0 }
 0x205   :  { %v973_v63 = vpop.f32.mrb[14].mxu1  ;;  %v504_v3 = vmax.f32 %v477_v62, 0.0 }
 0x206   :  { %v507_v1 = vmax.f32 %v973_v63, 0.0  ;;  %v480_v2 = vpop.f32.mrb[15].mxu1 }
 0x207   :  { %v505_v4 = vmax.f32 %v480_v2, 0.0 }
 0x208   :  { %v515_v5 = vpack.c.bf16 %v507_v1, %v506_v0 }
 0x209   :  { %v514_v6 = vpack.c.bf16 %v505_v4, %v504_v3 }
 0x20b   :  { %994 = vmatprep.mubr.msk.bf16.mxu1 %vm548_vm1, %v514_v6 }
 0x20c   :  { %995 = vmatmul.mubr.msk.bf16.gmra.mrb[28].mxu1 %vm548_vm1, %v515_v5 }
 0x2c7   :  { %v984_v7 = vpop.f32.mrb[16].mxu1 }
 0x2c8   :  { %v607_v8 = vpop.f32.mrb[17].mxu1 }
 0x2c9   :  { %v985_v9 = vpop.f32.mrb[18].mxu1 }
 0x2ca   :  { %v845_v10 = vpack.c.bf16 %v985_v9, %v984_v7  ;;  %v610_v11 = vpop.f32.mrb[19].mxu1 }
 0x2cb   :  { %v840_v12 = vpack.c.bf16 %v610_v11, %v607_v8 }
 0x2cc   :  { %877 = vst [vmem:[#allocation6 + $0x8] sm:$0xff] %v845_v10  }
 0x2cd   :  { %841 = vst [vmem:[#allocation6] sm:$0xff] %v840_v12  }
 0x2cf   :  { %v988_v13 = vpop.f32.mrb[20].mxu1 }
 0x2d0   :  { %v623_v14 = vpop.f32.mrb[21].mxu1 }
 0x2d1   :  { %v989_v15 = vpop.f32.mrb[22].mxu1 }
 0x2d2   :  { %v855_v16 = vpack.c.bf16 %v989_v15, %v988_v13  ;;  %v626_v17 = vpop.f32.mrb[23].mxu1 }
 0x2d3   :  { %v850_v18 = vpack.c.bf16 %v626_v17, %v623_v14 }
 0x2d4   :  { %879 = vst [vmem:[#allocation6 + $0x18] sm:$0xff] %v855_v16  }
 0x2d5   :  { %878 = vst [vmem:[#allocation6 + $0x10] sm:$0xff] %v850_v18  }
 0x2d7   :  { %v992_v19 = vpop.f32.mrb[24].mxu1 }
 0x2d8   :  { %v639_v20 = vpop.f32.mrb[25].mxu1 }
 0x2d9   :  { %v993_v21 = vpop.f32.mrb[26].mxu1 }
 0x2da   :  { %v865_v22 = vpack.c.bf16 %v993_v21, %v992_v19  ;;  %v642_v23 = vpop.f32.mrb[27].mxu1 }
 0x2db   :  { %v860_v24 = vpack.c.bf16 %v642_v23, %v639_v20 }
 0x2dc   :  { %881 = vst [vmem:[#allocation6 + $0x28] sm:$0xff] %v865_v22  }
 0x2dd   :  { %880 = vst [vmem:[#allocation6 + $0x20] sm:$0xff] %v860_v24  }
 0x2df   :  { %v996_v25 = vpop.f32.mrb[28].mxu1 }
 0x2e0   :  { %v655_v26 = vpop.f32.mrb[29].mxu1 }
 0x2e1   :  { %v997_v27 = vpop.f32.mrb[30].mxu1 }
 0x2e2   :  { %v875_v28 = vpack.c.bf16 %v997_v27, %v996_v25  ;;  %v658_v29 = vpop.f32.mrb[31].mxu1 }
 0x2e3   :  { %v870_v30 = vpack.c.bf16 %v658_v29, %v655_v26 }
 0x2e4   :  { %883 = vst [vmem:[#allocation6 + $0x38] sm:$0xff] %v875_v28  }
 0x2e5   :  { %882 = vst [vmem:[#allocation6 + $0x30] sm:$0xff] %v870_v30  }
 0x2e6   :  { %1058 = shalt.err (!%p1055_p12)
}
 0x2e7   :  { %s1059_s15 = scalar_lea.hbm %s1239_s4, 1024 }
 0x2e8   :  { %p1060_p13 = scmp.ne.s32.totalorder %s1239_s4, %s1059_s15  ;;  %p1063_p0 = scmp.lt.u32.totalorder %s1059_s15, %s1239_s4 }
 0x2ea   :  { %p1065_p1 = pnand %p1063_p0, %p1060_p13 }
 0x2ec   :  { %1068 = shalt.err (!%p1065_p1)
}
 0x2ed   :  { %761 = dma.vmem_to_hbm [thread:$0]  %s756_s2, 1024, %s1239_s4, [#allocation5], %s1074_s25, %s1074_s25, %s1075_s26  }
 0x2ee   :  { %1071 = dma.done.wait [#allocation5], 1024  }
 0x2ef   :  { %1072 = vsyncadd [#allocation5], 4294966272 }
 0x2f0   :  { %765 = vsyncpa [#allocation4], 1 }
 0x2f1   :  { %766 = vsyncpa [#allocation5], 1 }

</bundles_post_ra>
